<compile_context>
chip_gen: v7x
topology: tpu7x:2x2x1
jax: 0.10.0
libtpu: 0.0.40
codegen_flags: <defaults>
</compile_context>

<pallas_src>
import functools
import math

import jax
import jax.numpy as jnp
from jax import lax
from jax.experimental import pallas as pl
from jax.experimental.pallas import tpu as pltpu


def _round_up(a: int, b: int) -> int:
    return (a + b - 1) // b * b


def _pick_tile(size: int, pref: int, align: int) -> int:
    """Tile for a dim with size > pref: a multiple of `align` <= pref that
    minimizes round-up padding (tie-break: larger tile)."""
    lo = max(align, pref // 8)
    cands = {pref}
    for num, den in ((7, 8), (3, 4), (5, 8), (1, 2), (3, 8), (1, 4), (1, 8)):
        c = (pref * num // den) // align * align
        if c >= lo:
            cands.add(c)
    best_pad, best_c = None, None
    for c in sorted(cands, reverse=True):
        pad = _round_up(size, c) - size
        if best_pad is None or pad < best_pad:
            best_pad, best_c = pad, c
    return best_c


def _make_kernel(has_bias: bool, separate_acc: bool):
    """Kernel refs: (x, w, [bias], out, [acc_scratch])."""

    def kernel(*refs):
        if has_bias:
            x_ref, w_ref, b_ref, o_ref = refs[:4]
            rest = refs[4:]
        else:
            x_ref, w_ref, o_ref = refs[:3]
            b_ref = None
            rest = refs[3:]
        acc_ref = rest[0] if separate_acc else o_ref

        k = pl.program_id(2)

        @pl.when(k == 0)
        def _():
            acc_ref[...] = jnp.zeros_like(acc_ref)

        # x: (tm, tk), w: (tn, tk) -> contract the shared (last) K axis, so the
        # weight never needs an (N, K) -> (K, N) transpose/copy in HBM.
        acc_ref[...] += lax.dot_general(
            x_ref[...],
            w_ref[...],
            dimension_numbers=(((1,), (1,)), ((), ())),
            preferred_element_type=jnp.float32,
        )

        if has_bias or separate_acc:
            @pl.when(k == pl.num_programs(2) - 1)
            def _():
                out = acc_ref[...]
                if has_bias:
                    out = out + b_ref[...].astype(jnp.float32)
                o_ref[...] = out.astype(o_ref.dtype)
        # else: f32 accumulation happened directly in the resident o_ref block.

    return kernel


@functools.partial(jax.jit, static_argnames=("has_bias", "tm", "tn", "tk"))
def _linear_forward_impl(x, weight, bias, *, has_bias, tm, tn, tk):
    *lead, K = x.shape
    N, K_w = weight.shape
    assert K == K_w, "in_features mismatch"
    M = math.prod(lead) if lead else 1
    x2d = x.reshape(M, K)
    out_dtype = x.dtype
    separate_acc = jnp.dtype(out_dtype) != jnp.dtype(jnp.float32)

    # Sanitize preferred tile sizes (static python ints).
    tm = max(8, tm - tm % 8)
    tn = max(128, tn - tn % 128)
    tk = max(128, tk - tk % 128)

    # ---- tile / padding selection (minimal padding; full dims when they fit) ----
    if M <= tm:
        tm_eff = _round_up(M, 8)      # <= tm since tm % 8 == 0
        Mp = tm_eff
    else:
        tm_eff = _pick_tile(M, tm, 8)
        Mp = _round_up(M, tm_eff)
    if N <= tn:
        tn_eff, Np = N, N             # full-dim block: no padding needed
    else:
        tn_eff = _pick_tile(N, tn, 128)
        Np = _round_up(N, tn_eff)
    if K <= tk:
        tk_eff, Kp = K, K             # full-dim block: no padding needed
    else:
        tk_eff = _pick_tile(K, tk, 128)
        Kp = _round_up(K, tk_eff)

    # v7x has two TensorCores: make sure mid/large problems expose >= 2 blocks
    # along a "parallel" axis so both cores get work.
    if (Mp // tm_eff) * (Np // tn_eff) == 1 and Mp * Np >= 2 * 128 * 128:
        if tn_eff % 256 == 0:
            tn_eff //= 2
        elif tm_eff % 16 == 0 and tm_eff >= 128:
            tm_eff //= 2

    x_p = x2d if (Mp == M and Kp == K) else jnp.pad(x2d, ((0, Mp - M), (0, Kp - K)))
    w_p = weight if (Np == N and Kp == K) else jnp.pad(weight, ((0, Np - N), (0, Kp - K)))

    grid = (Mp // tm_eff, Np // tn_eff, Kp // tk_eff)

    x_spec = pl.BlockSpec((tm_eff, tk_eff), lambda i, j, k: (i, k))
    w_kwargs = {}
    if Mp <= 256 and grid[2] >= 3:
        # Small-M (GEMV / decode-like) with a deep K grid: HBM-bound on the
        # weight stream -> deepen weight buffering to hide DMA latency.
        w_kwargs["pipeline_mode"] = pl.Buffered(3)
    w_spec = pl.BlockSpec((tn_eff, tk_eff), lambda i, j, k: (j, k), **w_kwargs)
    o_spec = pl.BlockSpec((tm_eff, tn_eff), lambda i, j, k: (i, j))

    in_specs = [x_spec, w_spec]
    operands = [x_p, w_p]
    if has_bias:
        b_p = bias if Np == N else jnp.pad(bias, (0, Np - N))
        operands.append(b_p.reshape(1, Np))
        in_specs.append(pl.BlockSpec((1, tn_eff), lambda i, j, k: (0, j)))

    scratch_shapes = (
        [pltpu.VMEM((tm_eff, tn_eff), jnp.float32)] if separate_acc else []
    )

    itemsize = jnp.dtype(out_dtype).itemsize
    cost = pl.CostEstimate(
        flops=2 * M * N * K,
        transcendentals=0,
        bytes_accessed=(M * K + K * N + M * N + (N if has_bias else 0)) * itemsize,
    )
    compiler_params = pltpu.CompilerParams(
        dimension_semantics=("parallel", "parallel", "arbitrary"),
        vmem_limit_bytes=48 * 1024 * 1024,
    )

    y_p = pl.pallas_call(
        _make_kernel(has_bias, separate_acc),
        out_shape=jax.ShapeDtypeStruct((Mp, Np), out_dtype),
        grid_spec=pltpu.PrefetchScalarGridSpec(
            num_scalar_prefetch=0,
            grid=grid,
            in_specs=in_specs,
            out_specs=o_spec,
            scratch_shapes=scratch_shapes,
        ),
        compiler_params=compiler_params,
        cost_estimate=cost,
    )(*operands)

    y2d = y_p if (Mp == M and Np == N) else y_p[:M, :N]
    return y2d.reshape(*lead, N)


def linear_forward(x, weight, bias=None, *, tm=512, tn=512, tk=1024):
    """y = x @ weight.T (+ bias) for x of shape (*, in_features), weight (out, in)."""
    has_bias = bias is not None
    if not has_bias:
        # Dummy (never read) so the jit signature stays stable.
        bias = jnp.zeros((weight.shape[0],), dtype=x.dtype)
    return _linear_forward_impl(
        x, weight, bias, has_bias=has_bias, tm=tm, tn=tn, tk=tk
    )


if __name__ == "__main__":
    # Module config: Linear(in_features=32, out_features=64, bias=True)
    in_features = 32
    out_features = 64

    key = jax.random.PRNGKey(0)
    kx, kw, kb, kx2, kw2, kb2 = jax.random.split(key, 6)

    # Deterministic parameter init mirroring the module's __init__:
    #   weight = sf * (2 * U[0,1) - 1), bias = sf * (2 * U[0,1) - 1), sf = in**-0.5
    sf = in_features ** (-0.5)
    weight = sf * (2.0 * jax.random.uniform(
        kw, (out_features, in_features), dtype=jnp.float32) - 1.0)
    bias = sf * (2.0 * jax.random.uniform(
        kb, (out_features,), dtype=jnp.float32) - 1.0)

    # Example input with extra leading dims: (batch=2, seq=8, in_features=32)
    x = jax.random.normal(kx, (2, 8, in_features), dtype=jnp.float32)

    # Bias path.
    y = jax.block_until_ready(linear_forward(x, weight, bias))
    y_ref = x @ weight.T + bias
    assert y.shape == (2, 8, out_features), y.shape
    assert jnp.allclose(y, y_ref, atol=1e-5, rtol=1e-5), "mismatch vs reference (bias)"

    # No-bias path.
    y_nb = jax.block_until_ready(linear_forward(x, weight, None))
    assert jnp.allclose(y_nb, x @ weight.T, atol=1e-5, rtol=1e-5), \
        "mismatch vs reference (no bias)"

    # Second shape exercising the multi-step K reduction (accumulate into the
    # resident output block), K zero-padding, M tail padding and the 2-block
    # parallel split.  Tolerance is loose because the XLA reference matmul may
    # use a different MXU input-rounding mode than the Pallas kernel.
    M2, K2, N2 = 300, 640, 192
    sf2 = K2 ** (-0.5)
    w2 = sf2 * (2.0 * jax.random.uniform(kw2, (N2, K2), dtype=jnp.float32) - 1.0)
    b2 = sf2 * (2.0 * jax.random.uniform(kb2, (N2,), dtype=jnp.float32) - 1.0)
    x2 = jax.random.normal(kx2, (M2, K2), dtype=jnp.float32)
    y2 = jax.block_until_ready(linear_forward(x2, w2, b2, tk=256))
    y2_ref = x2 @ w2.T + b2
    assert y2.shape == (M2, N2), y2.shape
    assert float(jnp.max(jnp.abs(y2 - y2_ref))) < 1e-2, "mismatch vs reference (tiled K)"

    print("KERNEL_OK")
</pallas_src>

<mosaic_0001>
module attributes {stable_mosaic.version = 11 : i64} {
  func.func @kernel(%arg0: i32, %arg1: i32, %arg2: i32, %arg3: memref<16x32xf32, #tpu.memory_space<vmem>>, %arg4: memref<64x32xf32, #tpu.memory_space<vmem>>, %arg5: memref<1x64xf32, #tpu.memory_space<vmem>>, %arg6: memref<16x64xf32, #tpu.memory_space<vmem>>) attributes {dimension_semantics = [#tpu.dimension_semantics<parallel>, #tpu.dimension_semantics<parallel>, #tpu.dimension_semantics<arbitrary>], iteration_bounds = array<i64: 1, 1, 1>, scalar_prefetch = 0 : i64, scratch_operands = 0 : i64, tpu.core_type = #tpu.core_type<tc>, window_params = [{transform_indices = @transform_0, window_bounds = array<i64: 16, 32>}, {transform_indices = @transform_1, window_bounds = array<i64: 64, 32>}, {transform_indices = @transform_2, window_bounds = array<i64: 1, 64>}, {transform_indices = @transform_3, window_bounds = array<i64: 16, 64>}]} {
    %c0_i32 = arith.constant 0 : i32
    %0 = arith.cmpi eq, %arg2, %c0_i32 : i32
    %1 = arith.extui %0 : i1 to i32
    %c0_i32_0 = arith.constant 0 : i32
    %2 = arith.cmpi ne, %1, %c0_i32_0 : i32
    scf.if %2 {
      %cst_10 = arith.constant 0.000000e+00 : f32
      %12 = vector.broadcast %cst_10 : f32 to vector<16x64xf32>
      %c0_11 = arith.constant 0 : index
      %c0_12 = arith.constant 0 : index
      %13 = vector.load %arg6[%c0_11, %c0_12] : memref<16x64xf32, #tpu.memory_space<vmem>>, vector<16x64xf32>
      tpu.vector_store %arg6[%c0_11, %c0_12], %12 {strides = array<i32>} : memref<16x64xf32, #tpu.memory_space<vmem>>, vector<16x64xf32>,
    } else {
    }
    %c0 = arith.constant 0 : index
    %c0_1 = arith.constant 0 : index
    %3 = vector.load %arg6[%c0, %c0_1] : memref<16x64xf32, #tpu.memory_space<vmem>>, vector<16x64xf32>
    %c0_2 = arith.constant 0 : index
    %c0_3 = arith.constant 0 : index
    %4 = vector.load %arg3[%c0_2, %c0_3] : memref<16x32xf32, #tpu.memory_space<vmem>>, vector<16x32xf32>
    %c0_4 = arith.constant 0 : index
    %c0_5 = arith.constant 0 : index
    %5 = vector.load %arg4[%c0_4, %c0_5] : memref<64x32xf32, #tpu.memory_space<vmem>>, vector<64x32xf32>
    %cst = arith.constant dense<0.000000e+00> : vector<16x64xf32>
    %6 = tpu.matmul %4, %5, %cst {dimension_numbers = #tpu.dot_dimension_numbers<[1], [1], [0], [0], [0, 0, 1, 0], [], []>} : vector<16x32xf32>, vector<64x32xf32>, vector<16x64xf32> -> vector<16x64xf32>
    %7 = arith.addf %3, %6 : vector<16x64xf32>
    %c0_6 = arith.constant 0 : index
    %c0_7 = arith.constant 0 : index
    %8 = vector.load %arg6[%c0_6, %c0_7] : memref<16x64xf32, #tpu.memory_space<vmem>>, vector<16x64xf32>
    tpu.vector_store %arg6[%c0_6, %c0_7], %7 {strides = array<i32>} : memref<16x64xf32, #tpu.memory_space<vmem>>, vector<16x64xf32>,
    %c0_i32_8 = arith.constant 0 : i32
    %9 = arith.cmpi eq, %arg2, %c0_i32_8 : i32
    %10 = arith.extui %9 : i1 to i32
    %c0_i32_9 = arith.constant 0 : i32
    %11 = arith.cmpi ne, %10, %c0_i32_9 : i32
    scf.if %11 {
      %c0_10 = arith.constant 0 : index
      %c0_11 = arith.constant 0 : index
      %12 = vector.load %arg6[%c0_10, %c0_11] : memref<16x64xf32, #tpu.memory_space<vmem>>, vector<16x64xf32>
      %c0_12 = arith.constant 0 : index
      %c0_13 = arith.constant 0 : index
      %13 = vector.load %arg5[%c0_12, %c0_13] : memref<1x64xf32, #tpu.memory_space<vmem>>, vector<1x64xf32>
      %14 = vector.broadcast %13 : vector<1x64xf32> to vector<16x64xf32>
      %15 = arith.addf %12, %14 : vector<16x64xf32>
      %c0_14 = arith.constant 0 : index
      %c0_15 = arith.constant 0 : index
      %16 = vector.load %arg6[%c0_14, %c0_15] : memref<16x64xf32, #tpu.memory_space<vmem>>, vector<16x64xf32>
      tpu.vector_store %arg6[%c0_14, %c0_15], %15 {strides = array<i32>} : memref<16x64xf32, #tpu.memory_space<vmem>>, vector<16x64xf32>,
    } else {
    }
    return
  }
  func.func @transform_0(%arg0: i32, %arg1: i32, %arg2: i32) -> (i32, i32) {
    %c0_i32 = arith.constant 0 : i32
    return %arg0, %arg2 : i32, i32
  }
  func.func @transform_1(%arg0: i32, %arg1: i32, %arg2: i32) -> (i32, i32) {
    %c0_i32 = arith.constant 0 : i32
    return %arg1, %arg2 : i32, i32
  }
  func.func @transform_2(%arg0: i32, %arg1: i32, %arg2: i32) -> (i32, i32) {
    %c0_i32 = arith.constant 0 : i32
    %c0_i32_0 = arith.constant 0 : i32
    return %c0_i32, %arg1 : i32, i32
  }
  func.func @transform_3(%arg0: i32, %arg1: i32, %arg2: i32) -> (i32, i32) {
    %c0_i32 = arith.constant 0 : i32
    return %arg0, %arg1 : i32, i32
  }
}

</mosaic_0001>

<bundles_post_ra>
// kernel: _linear_forward_impl.1
= control target key start
LH: loop header
LB: loop body
LE: loop exit
PB: predicated region body
PF: predicated region fallthrough
CT: control target
= control target key end

     0   :  { %vm34_vm0 = vcmask 261120   ;;  %vm19_vm1 = vcmask 523264   ;;  %v269_v6 = vmov 0.0   ;;  %s368_s0 = inlined_call_operand.vmem [shape: f32[16,32], index: 0, kind: input, shape index: {}]   ;;  %s369_s1 = inlined_call_operand.vmem [shape: f32[64,32], index: 1, kind: input, shape index: {}]   ;;  %s370_s2 = inlined_call_operand.vmem [shape: f32[1,64], index: 2, kind: input, shape index: {}]   ;;  %s371_s3 = inlined_call_operand.hbm [shape: f32[16,64], index: 3, kind: output, shape index: {}]  }
   0x1   :  { %v26_v0 = vld [vmem:[%s369_s1] sm:$0xff]  ;;  %v27_v1 = vld [vmem:[%s369_s1 + $0x8] sm:$0xff]  ;;  %v28_v2 = vld [vmem:[%s369_s1 + $0x10] sm:$0xff]  ;;  %21 = vst.msk [vmem:[#allocation2 + $0x8] sm:$0xff] %vm19_vm1, %v269_v6 }
   0x2   :  { %v217_v3 = vpack.c.bf16 %v27_v1, %v26_v0  ;;  %vm304_vm2 = vmpackc.low %vm34_vm0, %vm34_vm0  ;;  %v29_v5 = vld [vmem:[%s369_s1 + $0x18] sm:$0xff]  ;;  %20 = vst.msk [vmem:[#allocation2] sm:$0xff] %vm19_vm1, %v269_v6  ;;  %v24_v8 = vld [vmem:[%s368_s0] sm:$0xff] }
   0x3   :  { %v223_v7 = vpack.c.bf16 %v29_v5, %v28_v2 }
   0x4   :  { %219 = vmatprep.subr.msk.bf16.mxu0 %vm304_vm2, %v217_v3 }
   0x5   :  { %8 = vsyncpa [#allocation3], 0  ;;  %222 = vmatpush3.bf16.xpose.msk.msra.mxu0 %vm304_vm2, %v217_v3  ;;  %214 = vmatprep.mubr.msk.f32.mxu0 %vm34_vm0, %v24_v8  ;;  %v30_v9 = vld [vmem:[%s369_s1 + $0x20] sm:$0xff]  ;;  %v31_v10 = vld [vmem:[%s369_s1 + $0x28] sm:$0xff]  ;;  %s270_s6 = smov [#allocation2]  }
   0x6   :  { %225 = vmatprep.subr.msk.bf16.mxu0 %vm304_vm2, %v223_v7  ;;  %v229_v11 = vpack.c.bf16 %v31_v10, %v30_v9  ;;  %v32_v12 = vld [vmem:[%s369_s1 + $0x30] sm:$0xff]  ;;  %v33_v13 = vld [vmem:[%s369_s1 + $0x38] sm:$0xff]  ;;  %v25_v15 = vld [vmem:[%s368_s0 + $0x8] sm:$0xff]  ;;  %s166_s7 = sshll.u32 %s270_s6, 4  ;;  %s167_s7 = int_to_ptr.vmem [resolvable:$true] %s166_s7 }
   0x7   :  { %v235_v14 = vpack.c.bf16 %v33_v13, %v32_v12  ;;  %v187_v22 = vld [vmem:[%s370_s2] ss:$0 sm:$0xff]  ;;  %s245_s0 = scalar_lea.vmem %s167_s7, 256  ;;  %p250_p1 = scmp.lt.s32.totalorder %s167_s7, %s167_s7 }
   0x8   :  { %v23_v16 = vld [vmem:[#allocation2 + $0x8] sm:$0xff]  ;;  %p246_p0 = scmp.ne.s32.totalorder %s167_s7, %s245_s0  ;;  %p251_p2 = scmp.lt.s32.totalorder %s245_s0, %s245_s0 }
   0x9   :  { %v22_v17 = vld [vmem:[#allocation2] sm:$0xff] }
   0xa   :  { %p252_p3 = por %p251_p2, %p250_p1 }
   0xc   :  { %p253_p4 = pnand %p252_p3, %p246_p0 }
   0xd   :  { %228 = vmatpush3.bf16.xpose.msk.msra.mxu0 %vm304_vm2, %v223_v7 }
   0xe   :  { %231 = vmatprep.subr.msk.bf16.mxu0 %vm304_vm2, %v229_v11 }
  0x15   :  { %234 = vmatpush3.bf16.xpose.msk.msra.mxu0 %vm304_vm2, %v229_v11 }
  0x16   :  { %237 = vmatprep.subr.msk.bf16.mxu0 %vm304_vm2, %v235_v14 }
  0x1d   :  { %240 = vmatpush3.bf16.xpose.msk.msra.mxu0 %vm304_vm2, %v235_v14 }
  0x24   :  { %215 = vmatmul.mubr.msk.f32.vlgmr.msra.gmra.mrb[0].mxu0 %vm34_vm0, %v25_v15 }
  0xf7   :  { %v216_v18 = vpop.f32.mrb[0].mxu0 }
  0xf8   :  { %v141_v19 = vadd.f32 %v216_v18, %v23_v16  ;;  %v131_v20 = vpop.f32.mrb[1].mxu0 }
  0xf9   :  { %v140_v21 = vadd.f32 %v131_v20, %v22_v17 }
  0xfa   :  { %144 = vst.msk [vmem:[#allocation2 + $0x8] sm:$0xff] %vm19_vm1, %v141_v19 }
  0xfb   :  { %143 = vst.msk [vmem:[#allocation2] sm:$0xff] %vm19_vm1, %v140_v21 }
 0x101   :  { %v149_v23 = vld [vmem:[#allocation2 + $0x8] sm:$0xff] }
 0x102   :  { %v148_v24 = vld [vmem:[#allocation2] sm:$0xff]  ;;  %v158_v25 = vadd.f32 %v187_v22, %v149_v23 }
 0x103   :  { %v157_v26 = vadd.f32 %v187_v22, %v148_v24 }
 0x104   :  { %160 = vst.msk [vmem:[#allocation2 + $0x8] sm:$0xff] %vm19_vm1, %v158_v25 }
 0x105   :  { %159 = vst.msk [vmem:[#allocation2] sm:$0xff] %vm19_vm1, %v157_v26 }
 0x106   :  { %256 = shalt.err (!%p253_p4)
}
 0x107   :  { %s257_s9 = scalar_lea.hbm %s371_s3, 256 }
 0x108   :  { %p258_p5 = scmp.ne.s32.totalorder %s371_s3, %s257_s9  ;;  %p261_p6 = scmp.lt.u32.totalorder %s257_s9, %s371_s3 }
 0x10a   :  { %p263_p7 = pnand %p261_p6, %p258_p5 }
 0x10c   :  { %266 = shalt.err (!%p263_p7)
}
 0x10d   :  { %s271_s14 = smov 128   ;;  %s272_s15 = smov 8  }
 0x10e   :  { %172 = dma.vmem_to_hbm [thread:$0]  %s167_s7, 256, %s371_s3, [#allocation3], %s271_s14, %s271_s14, %s272_s15  }
 0x10f   :  { %267 = dma.done.wait [#allocation3], 256  }
 0x110   :  { %268 = vsyncadd [#allocation3], 4294967040 }
 0x111   :  { %176 = vsyncpa [#allocation3], 1 }

</bundles_post_ra>
